<compile_context>
chip_gen: v6e
topology: v6e:2x2x1
jax: 0.10.0
libtpu: 0.0.40
codegen_flags: <defaults>
</compile_context>

<pallas_src>
import jax
import jax.numpy as jnp
from jax.experimental import pallas as pl
from jax.experimental.pallas import tpu as pltpu


_ROW_ALIGN = 16  # bf16 packs 16 rows per (16, 128) sublane tile -> unmasked vst


def _round_up(x, m):
    return ((x + m - 1) // m) * m


def _choose_batch_tile(batch, block_b):
    """Batch tile: multiple of 16; prefer an even number of >=2 grid steps so
    v7x's two TensorCores both get work (near-zero cost on v5e/v6e)."""
    if batch <= _ROW_ALIGN:
        # Tiny batch: a single step; 8-row (f32 sublane) alignment suffices.
        return _round_up(max(batch, 8), 8)
    full = _round_up(batch, _ROW_ALIGN)
    tb = min(_round_up(block_b, _ROW_ALIGN), full)
    n_steps = max(2, pl.cdiv(batch, tb))
    if n_steps % 2:
        n_steps += 1
    cand = _round_up(pl.cdiv(batch, n_steps), _ROW_ALIGN)
    if pl.cdiv(batch, cand) >= 2 and pl.cdiv(batch, cand) % 2 == 0:
        return cand
    return tb  # fallback: still a multiple of 16, just maybe an odd step count


def _vector_encoder_kernel(x_ref, w1_ref, b1_ref, w2_ref, b2_ref, o_ref):
    # In-kernel cast of x to the weights' compute dtype: free VPU filler under
    # the MXU, and keeps x's HBM traffic at its original (narrow) width.
    xw = x_ref[...].astype(w1_ref.dtype)

    # Layer 1: Linear + ReLU (MXU matmul, f32 accumulate; f32 epilogue).
    h = jnp.dot(xw, w1_ref[...], preferred_element_type=jnp.float32)
    h = jnp.maximum(h + b1_ref[...], 0.0)            # (TB,H1) + (1,H1) broadcast

    # Layer 2: Linear + ReLU.
    y = jnp.dot(h.astype(w2_ref.dtype), w2_ref[...],
                preferred_element_type=jnp.float32)
    y = jnp.maximum(y + b2_ref[...], 0.0)            # (TB,H2) + (1,H2) broadcast

    o_ref[...] = y.astype(o_ref.dtype)


def vector_encoder_forward(x, w1, b1, w2, b2, *, block_b=2048, out_dtype=None):
    """Fused two-layer MLP encoder (Linear+ReLU, Linear+ReLU).

    x  : (B, D_in)  — any float dtype; cast to w1.dtype inside the kernel.
    w1 : (D_in, H1) — PyTorch Linear weight, pre-transposed; pre-cast ONCE
                      (e.g. to bf16 via prepare_params) outside this wrapper.
    b1 : (1, H1)    — f32 (added to the f32 MXU accumulator).
    w2 : (H1, H2), b2 : (1, H2) — same conventions.
    block_b   : batch-tile cap (rows); rounded to a multiple of 16.
    out_dtype : output dtype; defaults to w1.dtype (bf16 weights -> bf16 out,
                halving the dominant writeback).  Pass jnp.float32 for f32 out.
    returns (B, H2).
    """
    B, D = x.shape
    H1 = w1.shape[1]
    H2 = w2.shape[1]
    if out_dtype is None:
        out_dtype = w1.dtype
    # Biases ride on the f32 accumulator.
    b1 = b1.astype(jnp.float32)
    b2 = b2.astype(jnp.float32)

    tb = _choose_batch_tile(B, block_b)
    grid = (pl.cdiv(B, tb),)

    bytes_io = (x.size * x.dtype.itemsize
                + w1.size * w1.dtype.itemsize + b1.size * b1.dtype.itemsize
                + w2.size * w2.dtype.itemsize + b2.size * b2.dtype.itemsize
                + B * H2 * jnp.dtype(out_dtype).itemsize)
    cost = pl.CostEstimate(
        flops=2 * B * (D * H1 + H1 * H2),
        transcendentals=0,
        bytes_accessed=int(bytes_io),
    )

    return pl.pallas_call(
        _vector_encoder_kernel,
        out_shape=jax.ShapeDtypeStruct((B, H2), out_dtype),
        grid_spec=pl.GridSpec(
            grid=grid,
            in_specs=[
                pl.BlockSpec((tb, D), lambda i: (i, 0)),    # x tile streams per step
                pl.BlockSpec((D, H1), lambda i: (0, 0)),    # weights VMEM-resident
                pl.BlockSpec((1, H1), lambda i: (0, 0)),
                pl.BlockSpec((H1, H2), lambda i: (0, 0)),
                pl.BlockSpec((1, H2), lambda i: (0, 0)),
            ],
            out_specs=pl.BlockSpec((tb, H2), lambda i: (i, 0)),
        ),
        compiler_params=pltpu.CompilerParams(
            dimension_semantics=("parallel",),   # shard batch tiles across TCs (v7x)
        ),
        cost_estimate=cost,
    )(x, w1, b1, w2, b2)


def init_params(key, d_in, hidden_units):
    """Deterministic synthetic init (uniform, PyTorch-Linear-like fan_in scaling)."""
    params = []
    in_units = [d_in] + list(hidden_units[:-1])
    for fin, fout in zip(in_units, hidden_units):
        kw, kb, key = jax.random.split(key, 3)
        bound = 1.0 / (fin ** 0.5)
        w = jax.random.uniform(kw, (fin, fout), jnp.float32, -bound, bound)
        b = jax.random.uniform(kb, (1, fout), jnp.float32, -bound, bound)
        params.append((w, b))
    return params


def prepare_params(params, compute_dtype=jnp.bfloat16):
    """One-time cast of the static Linear weights to the MXU compute dtype.
    Biases stay f32 (added to the f32 accumulator inside the kernel)."""
    return [(w.astype(compute_dtype), b.astype(jnp.float32)) for w, b in params]


if __name__ == "__main__":
    key = jax.random.PRNGKey(0)
    kx, kp, kx2 = jax.random.split(key, 3)

    obs_dim = 32
    hidden_units = [256, 256]   # d3rlpy VectorEncoder default
    (w1, b1), (w2, b2) = init_params(kp, obs_dim, hidden_units)

    def ref_fn(xx):
        return jnp.maximum(jnp.maximum(xx @ w1 + b1, 0.0) @ w2 + b2, 0.0)

    # 1) f32 weights, f32 output, exact-fit single tile — strict tolerance.
    x = jax.random.normal(kx, (16, obs_dim), jnp.float32)
    out = jax.block_until_ready(
        vector_encoder_forward(x, w1, b1, w2, b2, out_dtype=jnp.float32))
    assert out.shape == (16, hidden_units[-1]) and out.dtype == jnp.float32
    assert jnp.allclose(out, ref_fn(x), atol=1e-5, rtol=1e-5)

    # 2) bf16 fast path: weights pre-cast once, ragged batch (masked last tile,
    #    no wrapper pad/slice), bf16 output, 2-step parallel grid.
    (w1b, b1b), (w2b, b2b) = prepare_params([(w1, b1), (w2, b2)])
    x2 = jax.random.normal(kx2, (200, obs_dim), jnp.float32)
    out2 = jax.block_until_ready(
        vector_encoder_forward(x2, w1b, b1b, w2b, b2b, block_b=2048))
    assert out2.shape == (200, hidden_units[-1]) and out2.dtype == jnp.bfloat16
    assert jnp.allclose(out2.astype(jnp.float32), ref_fn(x2), atol=5e-2, rtol=5e-2)

    # 3) bf16 compute, f32 output (for consumers that require f32).
    out3 = jax.block_until_ready(
        vector_encoder_forward(x2, w1b, b1b, w2b, b2b, out_dtype=jnp.float32))
    assert out3.shape == (200, hidden_units[-1]) and out3.dtype == jnp.float32
    assert jnp.allclose(out3, ref_fn(x2), atol=5e-2, rtol=5e-2)

    print("KERNEL_OK")
</pallas_src>

<mosaic_0001>
module attributes {stable_mosaic.version = 11 : i64} {
  func.func @_vector_encoder_kernel(%arg0: i32, %arg1: memref<16x32xf32, #tpu.memory_space<vmem>>, %arg2: memref<32x256xf32, #tpu.memory_space<vmem>>, %arg3: memref<1x256xf32, #tpu.memory_space<vmem>>, %arg4: memref<256x256xf32, #tpu.memory_space<vmem>>, %arg5: memref<1x256xf32, #tpu.memory_space<vmem>>, %arg6: memref<16x256xf32, #tpu.memory_space<vmem>>) attributes {dimension_semantics = [#tpu.dimension_semantics<parallel>], iteration_bounds = array<i64: 1>, scalar_prefetch = 0 : i64, scratch_operands = 0 : i64, tpu.core_type = #tpu.core_type<tc>, window_params = [{transform_indices = @transform_0, window_bounds = array<i64: 16, 32>}, {pipeline_mode = #tpu.pipeline_mode<synchronous>, transform_indices = @transform_1, window_bounds = array<i64: 32, 256>}, {pipeline_mode = #tpu.pipeline_mode<synchronous>, transform_indices = @transform_2, window_bounds = array<i64: 1, 256>}, {pipeline_mode = #tpu.pipeline_mode<synchronous>, transform_indices = @transform_3, window_bounds = array<i64: 256, 256>}, {pipeline_mode = #tpu.pipeline_mode<synchronous>, transform_indices = @transform_4, window_bounds = array<i64: 1, 256>}, {transform_indices = @transform_5, window_bounds = array<i64: 16, 256>}]} {
    %c0 = arith.constant 0 : index
    %c0_0 = arith.constant 0 : index
    %0 = vector.load %arg1[%c0, %c0_0] : memref<16x32xf32, #tpu.memory_space<vmem>>, vector<16x32xf32>
    %c0_1 = arith.constant 0 : index
    %c0_2 = arith.constant 0 : index
    %1 = vector.load %arg2[%c0_1, %c0_2] : memref<32x256xf32, #tpu.memory_space<vmem>>, vector<32x256xf32>
    %cst = arith.constant dense<0.000000e+00> : vector<16x256xf32>
    %2 = tpu.matmul %0, %1, %cst {dimension_numbers = #tpu.dot_dimension_numbers<[1], [0], [0], [1], [0, 0, 1, 1], [], []>} : vector<16x32xf32>, vector<32x256xf32>, vector<16x256xf32> -> vector<16x256xf32>
    %c0_3 = arith.constant 0 : index
    %c0_4 = arith.constant 0 : index
    %3 = vector.load %arg3[%c0_3, %c0_4] : memref<1x256xf32, #tpu.memory_space<vmem>>, vector<1x256xf32>
    %4 = vector.broadcast %3 : vector<1x256xf32> to vector<16x256xf32>
    %5 = arith.addf %2, %4 : vector<16x256xf32>
    %cst_5 = arith.constant 0.000000e+00 : f32
    %6 = vector.broadcast %cst_5 : f32 to vector<16x256xf32>
    %7 = arith.maximumf %5, %6 : vector<16x256xf32>
    %c0_6 = arith.constant 0 : index
    %c0_7 = arith.constant 0 : index
    %8 = vector.load %arg4[%c0_6, %c0_7] : memref<256x256xf32, #tpu.memory_space<vmem>>, vector<256x256xf32>
    %cst_8 = arith.constant dense<0.000000e+00> : vector<16x256xf32>
    %9 = tpu.matmul %7, %8, %cst_8 {dimension_numbers = #tpu.dot_dimension_numbers<[1], [0], [0], [1], [0, 0, 1, 1], [], []>} : vector<16x256xf32>, vector<256x256xf32>, vector<16x256xf32> -> vector<16x256xf32>
    %c0_9 = arith.constant 0 : index
    %c0_10 = arith.constant 0 : index
    %10 = vector.load %arg5[%c0_9, %c0_10] : memref<1x256xf32, #tpu.memory_space<vmem>>, vector<1x256xf32>
    %11 = vector.broadcast %10 : vector<1x256xf32> to vector<16x256xf32>
    %12 = arith.addf %9, %11 : vector<16x256xf32>
    %cst_11 = arith.constant 0.000000e+00 : f32
    %13 = vector.broadcast %cst_11 : f32 to vector<16x256xf32>
    %14 = arith.maximumf %12, %13 : vector<16x256xf32>
    %c0_12 = arith.constant 0 : index
    %c0_13 = arith.constant 0 : index
    %15 = vector.load %arg6[%c0_12, %c0_13] : memref<16x256xf32, #tpu.memory_space<vmem>>, vector<16x256xf32>
    tpu.vector_store %arg6[%c0_12, %c0_13], %14 {strides = array<i32>} : memref<16x256xf32, #tpu.memory_space<vmem>>, vector<16x256xf32>,
    return
  }
  func.func @transform_0(%arg0: i32) -> (i32, i32) {
    %c0_i32 = arith.constant 0 : i32
    %c0_i32_0 = arith.constant 0 : i32
    return %arg0, %c0_i32 : i32, i32
  }
  func.func @transform_1(%arg0: i32) -> (i32, i32) {
    %c0_i32 = arith.constant 0 : i32
    %c0_i32_0 = arith.constant 0 : i32
    %c0_i32_1 = arith.constant 0 : i32
    return %c0_i32, %c0_i32_0 : i32, i32
  }
  func.func @transform_2(%arg0: i32) -> (i32, i32) {
    %c0_i32 = arith.constant 0 : i32
    %c0_i32_0 = arith.constant 0 : i32
    %c0_i32_1 = arith.constant 0 : i32
    return %c0_i32, %c0_i32_0 : i32, i32
  }
  func.func @transform_3(%arg0: i32) -> (i32, i32) {
    %c0_i32 = arith.constant 0 : i32
    %c0_i32_0 = arith.constant 0 : i32
    %c0_i32_1 = arith.constant 0 : i32
    return %c0_i32, %c0_i32_0 : i32, i32
  }
  func.func @transform_4(%arg0: i32) -> (i32, i32) {
    %c0_i32 = arith.constant 0 : i32
    %c0_i32_0 = arith.constant 0 : i32
    %c0_i32_1 = arith.constant 0 : i32
    return %c0_i32, %c0_i32_0 : i32, i32
  }
  func.func @transform_5(%arg0: i32) -> (i32, i32) {
    %c0_i32 = arith.constant 0 : i32
    %c0_i32_0 = arith.constant 0 : i32
    return %arg0, %c0_i32 : i32, i32
  }
}

</mosaic_0001>

<bundles_post_ra>
// kernel: tpu_custom_call.1
= control target key start
LH: loop header
LB: loop body
LE: loop exit
PB: predicated region body
PF: predicated region fallthrough
CT: control target
= control target key end

     0   :  { %10 = vsyncpa [#allocation3], 0  ;;  %s516_s0 = inlined_call_operand.hbm [shape: f32[16,32], index: 0, kind: input, shape index: {}]   ;;  %s517_s1 = inlined_call_operand.hbm [shape: f32[32,256], index: 1, kind: input, shape index: {}]   ;;  %s518_s2 = inlined_call_operand.vmem [shape: f32[1,256], index: 2, kind: input, shape index: {}]   ;;  %s519_s3 = inlined_call_operand.hbm [shape: f32[256,256], index: 3, kind: input, shape index: {}]   ;;  %s520_s4 = inlined_call_operand.vmem [shape: f32[1,256], index: 4, kind: input, shape index: {}]   ;;  %s521_s5 = inlined_call_operand.hbm [shape: f32[16,256], index: 5, kind: output, shape index: {}]  }
   0x1   :  { %11 = vsyncpa [#allocation6], 0 }
   0x2   :  { %12 = vsyncpa [#allocation4], 0  ;;  %s448_s18 = smov [#allocation5]  }
   0x3   :  { %s30_s19 = sshll.u32 %s448_s18, 4  ;;  %s31_s19 = int_to_ptr.vmem [resolvable:$true] %s30_s19 }
   0x4   :  { %s370_s20 = scalar_lea.vmem %s31_s19, 1024  ;;  %p375_p1 = scmp.lt.s32.totalorder %s31_s19, %s31_s19 }
   0x5   :  { %p371_p0 = scmp.ne.s32.totalorder %s31_s19, %s370_s20  ;;  %p376_p2 = scmp.lt.s32.totalorder %s370_s20, %s370_s20 }
   0x7   :  { %p377_p3 = por %p376_p2, %p375_p1 }
   0x9   :  { %p378_p4 = pnand %p377_p3, %p371_p0 }
   0xb   :  { %381 = shalt.err (!%p378_p4)
}
   0xc   :  { %s449_s21 = smov 256   ;;  %s450_s22 = smov 16  }
   0xd   :  { %36 = dma.hbm_to_vmem [thread:$0]  %s517_s1, 1024, %s31_s19, [#allocation6], %s449_s21, %s449_s21, %s450_s22  }
   0xe   :  { %s451_s25 = smov [#allocation2]  }
   0xf   :  { %s18_s26 = sshll.u32 %s451_s25, 4  ;;  %s19_s26 = int_to_ptr.vmem [resolvable:$true] %s18_s26 }
  0x10   :  { %s390_s27 = scalar_lea.vmem %s19_s26, 256  ;;  %p395_p6 = scmp.lt.s32.totalorder %s19_s26, %s19_s26 }
  0x11   :  { %p391_p5 = scmp.ne.s32.totalorder %s19_s26, %s390_s27  ;;  %p396_p7 = scmp.lt.s32.totalorder %s390_s27, %s390_s27 }
  0x13   :  { %p397_p8 = por %p396_p7, %p395_p6 }
  0x15   :  { %p398_p9 = pnand %p397_p8, %p391_p5 }
  0x17   :  { %401 = shalt.err (!%p398_p9)
}
  0x18   :  { %s452_s28 = smov 128   ;;  %s453_s29 = smov 8  }
  0x19   :  { %24 = dma.hbm_to_vmem [thread:$0]  %s516_s0, 256, %s19_s26, [#allocation3], %s452_s28, %s452_s28, %s453_s29  }
  0x1a   :  { %s454_s7 = smov [#allocation7]  }
  0x1b   :  { %s44_s8 = sshll.u32 %s454_s7, 4  ;;  %s45_s8 = int_to_ptr.vmem [resolvable:$true] %s44_s8 }
  0x1c   :  { %s410_s1 = scalar_lea.vmem %s45_s8, 8192  ;;  %p415_p11 = scmp.lt.s32.totalorder %s45_s8, %s45_s8 }
  0x1d   :  { %p411_p10 = scmp.ne.s32.totalorder %s45_s8, %s410_s1  ;;  %p416_p12 = scmp.lt.s32.totalorder %s410_s1, %s410_s1 }
  0x1f   :  { %p417_p13 = por %p416_p12, %p415_p11 }
  0x21   :  { %p418_p0 = pnand %p417_p13, %p411_p10 }
  0x23   :  { %421 = shalt.err (!%p418_p0)
}
  0x24   :  { %50 = dma.hbm_to_vmem [thread:$0]  %s519_s3, 8192, %s45_s8, [#allocation6], %s449_s21, %s449_s21, %s450_s22  }
  0x25   :  { %442 = dma.done.wait [#allocation3], 256  }
  0x26   :  { %443 = vsyncadd [#allocation3], 4294967040 }
  0x27   :  { %444 = dma.done.wait [#allocation6], 9216  }
  0x28   :  { %445 = vsyncadd [#allocation6], 4294958080  ;;  %v455_v0 = vmov 0.0   ;;  %v71_v1 = vld [vmem:[#allocation5 + $0x38] sm:$0xff]  ;;  %v70_v2 = vld [vmem:[#allocation5 + $0x30] sm:$0xff]  ;;  %vm84_vm0 = vcmask 261120  }
  0x29   :  { %155 = vmatprep.mubr.f32.mxu0 %v455_v0  ;;  %v69_v3 = vld [vmem:[#allocation5 + $0x28] sm:$0xff]  ;;  %115 = vmatprep.subr.mxu0 %v71_v1  ;;  %v68_v4 = vld [vmem:[#allocation5 + $0x20] sm:$0xff]  ;;  %v67_v5 = vld [vmem:[#allocation5 + $0x18] sm:$0xff]  ;;  %s456_s12 = smov [#allocation8]  }
  0x2a   :  { %116 = vmatpush1.msra.mxu0 %v70_v2  ;;  %v66_v6 = vld [vmem:[#allocation5 + $0x10] sm:$0xff]  ;;  %v203_v7 = vld [vmem:[#allocation7 + $0xf8] sm:$0xff]  ;;  %v65_v9 = vld [vmem:[#allocation5 + $0x8] sm:$0xff]  ;;  %s338_s13 = sshll.u32 %s456_s12, 4  ;;  %s339_s13 = int_to_ptr.vmem [resolvable:$true] %s338_s13 }
  0x2b   :  { %117 = vmatprep.subr.mxu0 %v69_v3  ;;  %v202_v8 = vld [vmem:[#allocation7 + $0xf0] sm:$0xff]  ;;  %248 = vmatprep.subr.mxu1 %v203_v7  ;;  %v201_v10 = vld [vmem:[#allocation7 + $0xe8] sm:$0xff]  ;;  %v200_v11 = vld [vmem:[#allocation7 + $0xe0] sm:$0xff]  ;;  %p427_p2 = scmp.lt.s32.totalorder %s339_s13, %s339_s13 }
  0x2c   :  { %118 = vmatpush1.msra.mxu0 %v68_v4  ;;  %v64_v12 = vld [vmem:[#allocation5] sm:$0xff]  ;;  %249 = vmatpush1.msra.mxu1 %v202_v8  ;;  %v199_v13 = vld [vmem:[#allocation7 + $0xd8] sm:$0xff]  ;;  %v62_v14 = vld [vmem:[#allocation2] sm:$0xff] }
  0x2d   :  { %119 = vmatprep.subr.mxu0 %v67_v5  ;;  %250 = vmatprep.subr.mxu1 %v201_v10  ;;  %v198_v15 = vld [vmem:[#allocation7 + $0xd0] sm:$0xff]  ;;  %v197_v16 = vld [vmem:[#allocation7 + $0xc8] sm:$0xff]  ;;  %v196_v17 = vld [vmem:[#allocation7 + $0xc0] sm:$0xff] }
  0x2e   :  { %120 = vmatpush1.msra.mxu0 %v66_v6  ;;  %251 = vmatpush1.msra.mxu1 %v200_v11  ;;  %v195_v18 = vld [vmem:[#allocation7 + $0xb8] sm:$0xff]  ;;  %v194_v20 = vld [vmem:[#allocation7 + $0xb0] sm:$0xff]  ;;  %v193_v21 = vld [vmem:[#allocation7 + $0xa8] sm:$0xff]  ;;  %v74_v11 = vlaneseq }
  0x2f   :  { %121 = vmatprep.subr.mxu0 %v65_v9  ;;  %252 = vmatprep.subr.mxu1 %v199_v13  ;;  %v63_v19 = vld [vmem:[#allocation2 + $0x8] sm:$0xff]  ;;  %v192_v22 = vld [vmem:[#allocation7 + $0xa0] sm:$0xff]  ;;  %v190_v24 = vld [vmem:[#allocation7 + $0x90] sm:$0xff] }
  0x30   :  { %122 = vmatpush1.msra.mxu0 %v64_v12  ;;  %253 = vmatpush1.msra.mxu1 %v198_v15  ;;  %v191_v23 = vld [vmem:[#allocation7 + $0x98] sm:$0xff]  ;;  %v189_v25 = vld [vmem:[#allocation7 + $0x88] sm:$0xff]  ;;  %v188_v26 = vld [vmem:[#allocation7 + $0x80] sm:$0xff]  ;;  %v75_v12 = vshrl.u32 %v74_v11, 7 }
  0x31   :  { %351 = vmatmul.mubr.msk.f32.vlgmr.msra.gmra.mxu0 %vm84_vm0, %v62_v14  ;;  %254 = vmatprep.subr.mxu1 %v197_v16  ;;  %v187_v27 = vld [vmem:[#allocation7 + $0x78] sm:$0xff]  ;;  %v186_v28 = vld [vmem:[#allocation7 + $0x70] sm:$0xff]  ;;  %v185_v29 = vld [vmem:[#allocation7 + $0x68] sm:$0xff] }
  0x32   :  { %161 = vmatprep.mubr.f32.mxu0 %v455_v0  ;;  %255 = vmatpush1.msra.mxu1 %v196_v17  ;;  %v184_v30 = vld [vmem:[#allocation7 + $0x60] sm:$0xff]  ;;  %v183_v31 = vld [vmem:[#allocation7 + $0x58] sm:$0xff]  ;;  %v182_v32 = vld [vmem:[#allocation7 + $0x50] sm:$0xff]  ;;  %v76_v13 = vsub.s32 0, %v75_v12  ;;  %v80_v15 = vsub.s32 1, %v75_v12 }
  0x33   :  { %256 = vmatprep.subr.mxu1 %v195_v18  ;;  %v181_v33 = vld [vmem:[#allocation7 + $0x48] sm:$0xff]  ;;  %v180_v34 = vld [vmem:[#allocation7 + $0x40] sm:$0xff]  ;;  %v179_v35 = vld [vmem:[#allocation7 + $0x38] sm:$0xff] }
  0x34   :  { %257 = vmatpush1.msra.mxu1 %v194_v20  ;;  %v178_v36 = vld [vmem:[#allocation7 + $0x30] sm:$0xff]  ;;  %v177_v37 = vld [vmem:[#allocation7 + $0x28] sm:$0xff]  ;;  %v176_v38 = vld [vmem:[#allocation7 + $0x20] sm:$0xff] }
  0x35   :  { %352 = vmatmul.mubr.msk.f32.gmra.mxu0 %vm84_vm0, %v63_v19  ;;  %258 = vmatprep.subr.mxu1 %v193_v21  ;;  %v175_v39 = vld [vmem:[#allocation7 + $0x18] sm:$0xff]  ;;  %v174_v40 = vld [vmem:[#allocation7 + $0x10] sm:$0xff]  ;;  %v173_v41 = vld [vmem:[#allocation7 + $0x8] sm:$0xff] }
  0x36   :  { %259 = vmatpush1.msra.mxu1 %v192_v22  ;;  %v172_v42 = vld [vmem:[#allocation7] sm:$0xff]  ;;  %v235_v43 = vld [vmem:[#allocation7 + $0x1f8] sm:$0xff]  ;;  %v234_v44 = vld [vmem:[#allocation7 + $0x1f0] sm:$0xff] }
  0x37   :  { %260 = vmatprep.subr.mxu1 %v191_v23  ;;  %v233_v45 = vld [vmem:[#allocation7 + $0x1e8] sm:$0xff]  ;;  %v232_v46 = vld [vmem:[#allocation7 + $0x1e0] sm:$0xff]  ;;  %v231_v47 = vld [vmem:[#allocation7 + $0x1d8] sm:$0xff] }
  0x38   :  { %261 = vmatpush1.msra.mxu1 %v190_v24  ;;  %v230_v48 = vld [vmem:[#allocation7 + $0x1d0] sm:$0xff]  ;;  %v229_v49 = vld [vmem:[#allocation7 + $0x1c8] sm:$0xff]  ;;  %v228_v50 = vld [vmem:[#allocation7 + $0x1c0] sm:$0xff] }
  0x39   :  { %262 = vmatprep.subr.mxu1 %v189_v25  ;;  %v227_v51 = vld [vmem:[#allocation7 + $0x1b8] sm:$0xff]  ;;  %v226_v52 = vld [vmem:[#allocation7 + $0x1b0] sm:$0xff]  ;;  %v225_v53 = vld [vmem:[#allocation7 + $0x1a8] sm:$0xff] }
  0x3a   :  { %263 = vmatpush1.msra.mxu1 %v188_v26  ;;  %v224_v54 = vld [vmem:[#allocation7 + $0x1a0] sm:$0xff]  ;;  %v223_v55 = vld [vmem:[#allocation7 + $0x198] sm:$0xff]  ;;  %v222_v56 = vld [vmem:[#allocation7 + $0x190] sm:$0xff] }
  0x3b   :  { %264 = vmatprep.subr.mxu1 %v187_v27  ;;  %v221_v57 = vld [vmem:[#allocation7 + $0x188] sm:$0xff]  ;;  %v220_v58 = vld [vmem:[#allocation7 + $0x180] sm:$0xff]  ;;  %v219_v59 = vld [vmem:[#allocation7 + $0x178] sm:$0xff] }
  0x3c   :  { %265 = vmatpush1.msra.mxu1 %v186_v28  ;;  %v218_v60 = vld [vmem:[#allocation7 + $0x170] sm:$0xff]  ;;  %v217_v61 = vld [vmem:[#allocation7 + $0x168] sm:$0xff]  ;;  %v216_v62 = vld [vmem:[#allocation7 + $0x160] sm:$0xff] }
  0x3d   :  { %266 = vmatprep.subr.mxu1 %v185_v29  ;;  %v215_v63 = vld [vmem:[#allocation7 + $0x158] sm:$0xff]  ;;  %v214_v0 = vld [vmem:[#allocation7 + $0x150] sm:$0xff]  ;;  %v213_v1 = vld [vmem:[#allocation7 + $0x148] sm:$0xff] }
  0x3e   :  { %267 = vmatpush1.msra.mxu1 %v184_v30  ;;  %v212_v2 = vld [vmem:[#allocation7 + $0x140] sm:$0xff]  ;;  %v211_v3 = vld [vmem:[#allocation7 + $0x138] sm:$0xff]  ;;  %v210_v4 = vld [vmem:[#allocation7 + $0x130] sm:$0xff] }
  0x3f   :  { %268 = vmatprep.subr.mxu1 %v183_v31  ;;  %v209_v5 = vld [vmem:[#allocation7 + $0x128] sm:$0xff]  ;;  %v208_v6 = vld [vmem:[#allocation7 + $0x120] sm:$0xff]  ;;  %v207_v7 = vld [vmem:[#allocation7 + $0x118] sm:$0xff] }
  0x40   :  { %269 = vmatpush1.msra.mxu1 %v182_v32  ;;  %v206_v8 = vld [vmem:[#allocation7 + $0x110] sm:$0xff]  ;;  %v205_v9 = vld [vmem:[#allocation7 + $0x108] sm:$0xff]  ;;  %v204_v10 = vld [vmem:[#allocation7 + $0x100] sm:$0xff] }
  0x41   :  { %270 = vmatprep.subr.mxu1 %v181_v33  ;;  %v72_v14 = vld [vmem:[%s518_s2] sm:$0x3] }
  0x42   :  { %271 = vmatpush1.msra.mxu1 %v180_v34  ;;  %v77_v16 = vrot.slane %v72_v14, %v76_v13  ;;  %v81_v17 = vrot.slane %v72_v14, %v80_v15  ;;  %v236_v30 = vld [vmem:[%s520_s4] sm:$0x3]  ;;  %s422_s4 = scalar_lea.vmem %s339_s13, 512 }
  0x43   :  { %272 = vmatprep.subr.mxu1 %v179_v35  ;;  %v241_v31 = vrot.slane %v236_v30, %v76_v13  ;;  %v245_v32 = vrot.slane %v236_v30, %v80_v15  ;;  %p423_p1 = scmp.ne.s32.totalorder %s339_s13, %s422_s4  ;;  %p428_p3 = scmp.lt.s32.totalorder %s422_s4, %s422_s4 }
  0x44   :  { %273 = vmatpush1.msra.mxu1 %v178_v36 }
  0x45   :  { %274 = vmatprep.subr.mxu1 %v177_v37  ;;  %p429_p4 = por %p428_p3, %p427_p2 }
  0x46   :  { %275 = vmatpush1.msra.mxu1 %v176_v38 }
  0x47   :  { %276 = vmatprep.subr.mxu1 %v175_v39  ;;  %p430_p5 = pnand %p429_p4, %p423_p1 }
  0x48   :  { %277 = vmatpush1.msra.mxu1 %v174_v40 }
  0x49   :  { %278 = vmatprep.subr.mxu1 %v173_v41 }
  0x4a   :  { %279 = vmatpush1.msra.mxu1 %v172_v42 }
  0x4b   :  { %280 = vmatprep.subr.mxu1 %v235_v43 }
  0x4c   :  { %281 = vmatpush2.msra.mxu1 %v234_v44 }
  0x4d   :  { %282 = vmatprep.subr.mxu1 %v233_v45 }
  0x4e   :  { %283 = vmatpush2.msra.mxu1 %v232_v46 }
  0x4f   :  { %284 = vmatprep.subr.mxu1 %v231_v47 }
  0x50   :  { %285 = vmatpush2.msra.mxu1 %v230_v48 }
  0x51   :  { %286 = vmatprep.subr.mxu1 %v229_v49 }
  0x52   :  { %287 = vmatpush2.msra.mxu1 %v228_v50 }
  0x53   :  { %288 = vmatprep.subr.mxu1 %v227_v51 }
  0x54   :  { %289 = vmatpush2.msra.mxu1 %v226_v52 }
  0x55   :  { %290 = vmatprep.subr.mxu1 %v225_v53 }
  0x56   :  { %291 = vmatpush2.msra.mxu1 %v224_v54 }
  0x57   :  { %292 = vmatprep.subr.mxu1 %v223_v55 }
  0x58   :  { %293 = vmatpush2.msra.mxu1 %v222_v56 }
  0x59   :  { %294 = vmatprep.subr.mxu1 %v221_v57 }
  0x5a   :  { %295 = vmatpush2.msra.mxu1 %v220_v58 }
  0x5b   :  { %296 = vmatprep.subr.mxu1 %v219_v59 }
  0x5c   :  { %297 = vmatpush2.msra.mxu1 %v218_v60 }
  0x5d   :  { %298 = vmatprep.subr.mxu1 %v217_v61 }
  0x5e   :  { %299 = vmatpush2.msra.mxu1 %v216_v62 }
  0x5f   :  { %300 = vmatprep.subr.mxu1 %v215_v63 }
  0x60   :  { %301 = vmatpush2.msra.mxu1 %v214_v0 }
  0x61   :  { %302 = vmatprep.subr.mxu1 %v213_v1 }
  0x62   :  { %303 = vmatpush2.msra.mxu1 %v212_v2 }
  0x63   :  { %304 = vmatprep.subr.mxu1 %v211_v3 }
  0x64   :  { %305 = vmatpush2.msra.mxu1 %v210_v4 }
  0x65   :  { %306 = vmatprep.subr.mxu1 %v209_v5 }
  0x66   :  { %307 = vmatpush2.msra.mxu1 %v208_v6 }
  0x67   :  { %308 = vmatprep.subr.mxu1 %v207_v7 }
  0x68   :  { %309 = vmatpush2.msra.mxu1 %v206_v8 }
  0x69   :  { %310 = vmatprep.subr.mxu1 %v205_v9 }
  0x6a   :  { %311 = vmatpush2.msra.mxu1 %v204_v10 }
  0xf1   :  { %v157_v18 = vpop.f32.mrf.mxu0 }
  0xf2   :  { %v158_v19 = vadd.f32 %v157_v18, %v77_v16 }
  0xf3   :  { %v159_v20 = vpop.f32.mrf.mxu0 }
  0xf4   :  { %v160_v21 = vadd.f32 %v159_v20, %v81_v17  ;;  %v168_v24 = vmax.f32 %v158_v19, 0.0 }
  0xf5   :  { %v163_v22 = vpop.f32.mrf.mxu0 }
  0xf6   :  { %v169_v23 = vmax.f32 %v160_v21, 0.0  ;;  %v164_v25 = vadd.f32 %v163_v22, %v77_v16 }
  0xf7   :  { %v165_v26 = vpop.f32.mrf.mxu0 }
  0xf8   :  { %v166_v27 = vadd.f32 %v165_v26, %v81_v17  ;;  %312 = vmatprep.mubr.f32.mxu1 %v169_v23  ;;  %v170_v29 = vmax.f32 %v164_v25, 0.0 }
  0xf9   :  { %313 = vmatmul.mubr.f32.vlgmr.msra.gmra.mxu1 %v168_v24 }
  0xfa   :  { %v171_v28 = vmax.f32 %v166_v27, 0.0 }
  0xfc   :  { %318 = vmatprep.mubr.f32.mxu1 %v171_v28 }
  0xfd   :  { %319 = vmatmul.mubr.f32.gmra.mxu1 %v170_v29 }
 0x1b9   :  { %v314_v33 = vpop.f32.mrf.mxu1 }
 0x1ba   :  { %v315_v34 = vadd.f32 %v314_v33, %v241_v31 }
 0x1bb   :  { %v316_v35 = vpop.f32.mrf.mxu1 }
 0x1bc   :  { %v325_v36 = vmax.f32 %v315_v34, 0.0  ;;  %v317_v37 = vadd.f32 %v316_v35, %v245_v32 }
 0x1bd   :  { %v320_v38 = vpop.f32.mrf.mxu1 }
 0x1be   :  { %329 = vst [vmem:[#allocation8] sm:$0xff] %v325_v36  ;;  %v326_v39 = vmax.f32 %v317_v37, 0.0  ;;  %v321_v40 = vadd.f32 %v320_v38, %v241_v31 }
 0x1bf   :  { %v322_v41 = vpop.f32.mrf.mxu1 }
 0x1c0   :  { %330 = vst [vmem:[#allocation8 + $0x8] sm:$0xff] %v326_v39  ;;  %v327_v42 = vmax.f32 %v321_v40, 0.0  ;;  %v323_v43 = vadd.f32 %v322_v41, %v245_v32 }
 0x1c2   :  { %331 = vst [vmem:[#allocation8 + $0x10] sm:$0xff] %v327_v42  ;;  %v328_v44 = vmax.f32 %v323_v43, 0.0 }
 0x1c4   :  { %332 = vst [vmem:[#allocation8 + $0x18] sm:$0xff] %v328_v44 }
 0x1c5   :  { %433 = shalt.err (!%p430_p5)
}
 0x1c6   :  { %344 = dma.vmem_to_hbm [thread:$0]  %s339_s13, 512, %s521_s5, [#allocation4], %s449_s21, %s449_s21, %s450_s22  }
 0x1c7   :  { %446 = dma.done.wait [#allocation4], 512  }
 0x1c8   :  { %447 = vsyncadd [#allocation4], 4294966784 }
 0x1c9   :  { %348 = vsyncpa [#allocation3], 1 }
 0x1ca   :  { %349 = vsyncpa [#allocation6], 1 }
 0x1cb   :  { %350 = vsyncpa [#allocation4], 1 }

</bundles_post_ra>
